<compile_context>
chip_gen: v7x
topology: tpu7x:2x2x1
jax: 0.10.0
libtpu: 0.0.40
codegen_flags: <defaults>
</compile_context>

<pallas_src>
import jax
import jax.numpy as jnp
from jax.experimental import pallas as pl
from jax.experimental.pallas import tpu as pltpu

BN_EPS = 1e-5        # nn.BatchNorm2d default eps
NORM_EPS = 1e-12     # F.normalize default eps


def _round_up(x, m):
    return (x + m - 1) // m * m


# --------------------------------------------------------------------------
# Pass 1: per-split, per-channel sum / sum-of-squares of y = x @ W1^T + b1
# --------------------------------------------------------------------------
def _stats_kernel(x_ref, w1t_ref, b1_ref, sum_ref, sumsq_ref):
    i = pl.program_id(1)                    # tile index within this split

    @pl.when(i == 0)
    def _():
        sum_ref[...] = jnp.zeros_like(sum_ref)
        sumsq_ref[...] = jnp.zeros_like(sumsq_ref)

    # bf16 x bf16 -> f32 accumulate on the MXU (weights pre-transposed).
    y = jnp.dot(x_ref[...], w1t_ref[...], preferred_element_type=jnp.float32)
    y = y + b1_ref[...]

    # No tail masking here: zero-padded x rows contribute exactly b1 / b1^2;
    # the wrapper subtracts that after the fact.
    sum_ref[...] += jnp.sum(y, axis=0, keepdims=True)        # bcast to 8 rows
    sumsq_ref[...] += jnp.sum(y * y, axis=0, keepdims=True)


# --------------------------------------------------------------------------
# Pass 2: conv1 with BN pre-folded into weights, ReLU, conv2, L2 normalize
# --------------------------------------------------------------------------
def _apply_kernel(x_ref, w1s_ref, shift_ref, w2t_ref, b2_ref, o_ref):
    y = jnp.dot(x_ref[...], w1s_ref[...], preferred_element_type=jnp.float32)
    y = jnp.maximum(y + shift_ref[...], 0.0)                 # folded BN + ReLU

    z = jnp.dot(y.astype(w2t_ref.dtype), w2t_ref[...],
                preferred_element_type=jnp.float32)
    z = z + b2_ref[...]

    # F.normalize: z / max(||z||, eps)  ==  z * rsqrt(max(sum z^2, eps^2)).
    # (padded embedding lanes are exactly zero, so they don't affect the norm)
    sumsq = jnp.sum(z * z, axis=1, keepdims=True)
    inv = jax.lax.rsqrt(jnp.maximum(sumsq, NORM_EPS * NORM_EPS))
    o_ref[...] = (z * inv).astype(o_ref.dtype)


def embedding_head_forward(x, w1, b1, gamma, beta, w2, b2, *,
                           tile_p=1024, channels_last=False,
                           out_dtype=jnp.bfloat16):
    """Forward of EmbeddingHead(embed='convmlp') with training-mode BatchNorm.

    x: [N, C, H, W] (default) or [N, H, W, C] if channels_last=True.
    Returns [N, E, H, W] (or [N, H, W, E]) in `out_dtype`.
    """
    # TODO(synk): eval-mode BatchNorm (running mean/var use + update) is not
    # implemented; this mirrors the training-mode forward only.
    if channels_last:
        N, H, W, C = x.shape
        x_pc = x.reshape(N * H * W, C)
    else:
        N, C, H, W = x.shape
        # TODO(synk): this NCHW -> pixel-major transpose (and its inverse
        # below) is extra HBM glue; feed channels-last tensors to skip it.
        x_pc = jnp.transpose(x, (0, 2, 3, 1)).reshape(N * H * W, C)
    E = w2.shape[0]
    P = N * H * W

    # Lane-dense channel axes (no-op for the default dim_in = embed_dim = 256).
    # TODO(synk): for genuinely small channel counts (e.g. C=E=32) pack 4
    # pixels per 128-lane row instead of paying the 4x zero-pad HBM tax.
    Cp = _round_up(C, 128)
    Ep = _round_up(E, 128)

    tile_p = max(8, min(tile_p, _round_up(P, 8)))
    # Two per-split accumulators so both v7x TensorCores share pass 1.
    num_splits = 2 if pl.cdiv(P, tile_p) >= 2 else 1
    Pp = _round_up(P, num_splits * tile_p)
    tiles_per_split = Pp // (num_splits * tile_p)
    num_tiles = Pp // tile_p
    pad_rows = Pp - P

    x_pc = jnp.pad(x_pc, ((0, Pp - P), (0, Cp - C))).astype(jnp.bfloat16)

    # Pre-transposed, zero-padded weights (1x1 conv == channel matmul).
    w1t_f = jnp.pad(w1.T.astype(jnp.float32), ((0, Cp - C), (0, Cp - C)))
    w2t_f = jnp.pad(w2.T.astype(jnp.float32), ((0, Cp - C), (0, Ep - E)))
    b1_f = jnp.pad(b1.astype(jnp.float32), (0, Cp - C))
    b2_f = jnp.pad(b2.astype(jnp.float32), (0, Ep - E))
    gamma_f = jnp.pad(gamma.astype(jnp.float32), (0, Cp - C))
    beta_f = jnp.pad(beta.astype(jnp.float32), (0, Cp - C))

    w1t = w1t_f.astype(jnp.bfloat16)
    b1_row = b1_f.reshape(1, Cp)

    # --- pass 1: global per-channel batch statistics (per-split partials) ----
    # NOTE: in_specs[0] is a cheap knob to sweep with pipeline_mode=pl.Buffered(3)
    # on a DMA-dominated pass; default double-buffering is used here.
    ysum_blk, ysq_blk = pl.pallas_call(
        _stats_kernel,
        out_shape=(jax.ShapeDtypeStruct((num_splits * 8, Cp), jnp.float32),
                   jax.ShapeDtypeStruct((num_splits * 8, Cp), jnp.float32)),
        grid=(num_splits, tiles_per_split),
        in_specs=[
            pl.BlockSpec((tile_p, Cp),
                         lambda s, i: (s * tiles_per_split + i, 0)),  # x tile
            pl.BlockSpec((Cp, Cp), lambda s, i: (0, 0)),   # W1^T (resident)
            pl.BlockSpec((1, Cp), lambda s, i: (0, 0)),    # b1   (resident)
        ],
        out_specs=(pl.BlockSpec((8, Cp), lambda s, i: (s, 0)),
                   pl.BlockSpec((8, Cp), lambda s, i: (s, 0))),
        compiler_params=pltpu.CompilerParams(
            dimension_semantics=("parallel", "arbitrary")),
    )(x_pc, w1t, b1_row)

    # Rows within each split block are identical (broadcast accumulate); take
    # row 0 per split, reduce split partials in f32 on the tiny [Cp] vectors.
    ysum = ysum_blk.reshape(num_splits, 8, Cp)[:, 0, :].sum(axis=0)
    ysumsq = ysq_blk.reshape(num_splits, 8, Cp)[:, 0, :].sum(axis=0)
    # Remove the contribution of the zero-padded rows (each adds b1 / b1^2).
    ysum = ysum - pad_rows * b1_f
    ysumsq = ysumsq - pad_rows * b1_f * b1_f

    # TODO(synk): for very large P, E[y^2]-E[y]^2 in f32 loses precision;
    # accumulate more partials (e.g. per tile) or use a shifted/Welford form.
    mean = ysum / P
    var = jnp.maximum(ysumsq / P - mean * mean, 0.0)         # biased (training)
    scale = gamma_f * jax.lax.rsqrt(var + BN_EPS)

    # Fold BN into the pass-2 operands: y_bn = x @ (W1^T * scale) + shift'.
    w1s = (w1t_f * scale[None, :]).astype(jnp.bfloat16)      # [Cp, Cp]
    shift = (scale * (b1_f - mean) + beta_f).reshape(1, Cp)
    b2_row = b2_f.reshape(1, Ep)

    # --- pass 2: folded conv1+BN, ReLU, conv2, L2 normalize (parallel tiles) --
    out_pe = pl.pallas_call(
        _apply_kernel,
        out_shape=jax.ShapeDtypeStruct((Pp, Ep), out_dtype),
        grid=(num_tiles,),
        in_specs=[
            pl.BlockSpec((tile_p, Cp), lambda i: (i, 0)),    # x tile
            pl.BlockSpec((Cp, Cp), lambda i: (0, 0)),        # W1s^T (resident)
            pl.BlockSpec((1, Cp), lambda i: (0, 0)),         # shift'
            pl.BlockSpec((Cp, Ep), lambda i: (0, 0)),        # W2^T
            pl.BlockSpec((1, Ep), lambda i: (0, 0)),         # b2
        ],
        out_specs=pl.BlockSpec((tile_p, Ep), lambda i: (i, 0)),
        compiler_params=pltpu.CompilerParams(
            dimension_semantics=("parallel",)),              # v7x: 2 TCs
    )(x_pc, w1s, shift, w2t_f.astype(jnp.bfloat16), b2_row)

    out = out_pe[:P, :E].reshape(N, H, W, E)
    if channels_last:
        return out
    return jnp.transpose(out, (0, 3, 1, 2))


def _reference(x_nchw, w1, b1, gamma, beta, w2, b2):
    """Pure-JAX f32 reference mirroring the PyTorch forward."""
    N, C, H, W = x_nchw.shape
    xp = jnp.transpose(x_nchw, (0, 2, 3, 1)).reshape(-1, C)
    y = xp @ w1.T + b1
    mean = jnp.mean(y, axis=0)
    var = jnp.mean((y - mean) ** 2, axis=0)
    y = (y - mean) / jnp.sqrt(var + BN_EPS) * gamma + beta
    y = jnp.maximum(y, 0.0)
    z = y @ w2.T + b2
    n = jnp.sqrt(jnp.sum(z * z, axis=1, keepdims=True))
    z = z / jnp.maximum(n, NORM_EPS)
    return jnp.transpose(z.reshape(N, H, W, -1), (0, 3, 1, 2))


if __name__ == "__main__":
    # Module defaults dim_in = embed_dim = 256 (already lane-aligned, so no
    # padding tax); small batch/spatial. H*W=100 with tile_p=128 exercises the
    # ragged-tail stats correction, the two-way pass-1 split and a multi-tile
    # pass-2 grid.
    N, C, E, H, W = 2, 256, 256, 10, 10

    key = jax.random.PRNGKey(0)
    kx, kw1, kb1, kw2, kb2, kg, kbt = jax.random.split(key, 7)

    x = jax.random.normal(kx, (N, C, H, W), dtype=jnp.float32)
    w1 = 0.05 * jax.random.normal(kw1, (C, C), dtype=jnp.float32)
    b1 = 0.1 * jax.random.normal(kb1, (C,), dtype=jnp.float32)
    gamma = 1.0 + 0.1 * jax.random.normal(kg, (C,), dtype=jnp.float32)
    beta = 0.1 * jax.random.normal(kbt, (C,), dtype=jnp.float32)
    w2 = 0.05 * jax.random.normal(kw2, (E, C), dtype=jnp.float32)
    b2 = 0.1 * jax.random.normal(kb2, (E,), dtype=jnp.float32)

    out = embedding_head_forward(x, w1, b1, gamma, beta, w2, b2, tile_p=128)
    out = jax.block_until_ready(out)

    ref = _reference(x, w1, b1, gamma, beta, w2, b2)
    assert out.shape == (N, E, H, W)
    err = float(jnp.max(jnp.abs(out.astype(jnp.float32) - ref)))
    # bf16 MXU inputs with f32 accumulation + bf16 L2-normalized output
    # (entries <= 1): loose but meaningful tolerance.
    assert err < 2e-2, f"max abs err {err}"

    print("KERNEL_OK")
</pallas_src>

<mosaic_0001>
module attributes {stable_mosaic.version = 11 : i64} {
  func.func @_stats_kernel(%arg0: i32, %arg1: i32, %arg2: memref<128x256xbf16, #tpu.memory_space<vmem>>, %arg3: memref<256x256xbf16, #tpu.memory_space<vmem>>, %arg4: memref<1x256xf32, #tpu.memory_space<vmem>>, %arg5: memref<8x256xf32, #tpu.memory_space<vmem>>, %arg6: memref<8x256xf32, #tpu.memory_space<vmem>>) attributes {dimension_semantics = [#tpu.dimension_semantics<parallel>, #tpu.dimension_semantics<arbitrary>], iteration_bounds = array<i64: 2, 1>, scalar_prefetch = 0 : i64, scratch_operands = 0 : i64, tpu.core_type = #tpu.core_type<tc>, window_params = [{transform_indices = @transform_0, window_bounds = array<i64: 128, 256>}, {pipeline_mode = #tpu.pipeline_mode<synchronous>, transform_indices = @transform_1, window_bounds = array<i64: 256, 256>}, {pipeline_mode = #tpu.pipeline_mode<synchronous>, transform_indices = @transform_2, window_bounds = array<i64: 1, 256>}, {transform_indices = @transform_3, window_bounds = array<i64: 8, 256>}, {transform_indices = @transform_4, window_bounds = array<i64: 8, 256>}]} {
    %c0_i32 = arith.constant 0 : i32
    %0 = arith.cmpi eq, %arg1, %c0_i32 : i32
    %1 = arith.extui %0 : i1 to i32
    %c0_i32_0 = arith.constant 0 : i32
    %2 = arith.cmpi ne, %1, %c0_i32_0 : i32
    scf.if %2 {
      %cst_16 = arith.constant 0.000000e+00 : f32
      %22 = vector.broadcast %cst_16 : f32 to vector<8x256xf32>
      %c0_17 = arith.constant 0 : index
      %c0_18 = arith.constant 0 : index
      %23 = vector.load %arg5[%c0_17, %c0_18] : memref<8x256xf32, #tpu.memory_space<vmem>>, vector<8x256xf32>
      tpu.vector_store %arg5[%c0_17, %c0_18], %22 {strides = array<i32>} : memref<8x256xf32, #tpu.memory_space<vmem>>, vector<8x256xf32>,
      %cst_19 = arith.constant 0.000000e+00 : f32
      %24 = vector.broadcast %cst_19 : f32 to vector<8x256xf32>
      %c0_20 = arith.constant 0 : index
      %c0_21 = arith.constant 0 : index
      %25 = vector.load %arg6[%c0_20, %c0_21] : memref<8x256xf32, #tpu.memory_space<vmem>>, vector<8x256xf32>
      tpu.vector_store %arg6[%c0_20, %c0_21], %24 {strides = array<i32>} : memref<8x256xf32, #tpu.memory_space<vmem>>, vector<8x256xf32>,
    } else {
    }
    %c0 = arith.constant 0 : index
    %c0_1 = arith.constant 0 : index
    %3 = vector.load %arg2[%c0, %c0_1] : memref<128x256xbf16, #tpu.memory_space<vmem>>, vector<128x256xbf16>
    %c0_2 = arith.constant 0 : index
    %c0_3 = arith.constant 0 : index
    %4 = vector.load %arg3[%c0_2, %c0_3] : memref<256x256xbf16, #tpu.memory_space<vmem>>, vector<256x256xbf16>
    %cst = arith.constant dense<0.000000e+00> : vector<128x256xf32>
    %5 = tpu.matmul %3, %4, %cst {dimension_numbers = #tpu.dot_dimension_numbers<[1], [0], [0], [1], [0, 0, 1, 1], [], []>} : vector<128x256xbf16>, vector<256x256xbf16>, vector<128x256xf32> -> vector<128x256xf32>
    %c0_4 = arith.constant 0 : index
    %c0_5 = arith.constant 0 : index
    %6 = vector.load %arg4[%c0_4, %c0_5] : memref<1x256xf32, #tpu.memory_space<vmem>>, vector<1x256xf32>
    %7 = vector.broadcast %6 : vector<1x256xf32> to vector<128x256xf32>
    %8 = arith.addf %5, %7 : vector<128x256xf32>
    %c0_6 = arith.constant 0 : index
    %c0_7 = arith.constant 0 : index
    %9 = vector.load %arg5[%c0_6, %c0_7] : memref<8x256xf32, #tpu.memory_space<vmem>>, vector<8x256xf32>
    %cst_8 = arith.constant dense<0.000000e+00> : vector<256xf32>
    %10 = vector.multi_reduction <add>, %8, %cst_8 [0] : vector<128x256xf32> to vector<256xf32>
    %11 = vector.shape_cast %10 : vector<256xf32> to vector<1x256xf32>
    %12 = vector.broadcast %11 : vector<1x256xf32> to vector<8x256xf32>
    %13 = arith.addf %9, %12 : vector<8x256xf32>
    %c0_9 = arith.constant 0 : index
    %c0_10 = arith.constant 0 : index
    %14 = vector.load %arg5[%c0_9, %c0_10] : memref<8x256xf32, #tpu.memory_space<vmem>>, vector<8x256xf32>
    tpu.vector_store %arg5[%c0_9, %c0_10], %13 {strides = array<i32>} : memref<8x256xf32, #tpu.memory_space<vmem>>, vector<8x256xf32>,
    %c0_11 = arith.constant 0 : index
    %c0_12 = arith.constant 0 : index
    %15 = vector.load %arg6[%c0_11, %c0_12] : memref<8x256xf32, #tpu.memory_space<vmem>>, vector<8x256xf32>
    %16 = arith.mulf %8, %8 : vector<128x256xf32>
    %cst_13 = arith.constant dense<0.000000e+00> : vector<256xf32>
    %17 = vector.multi_reduction <add>, %16, %cst_13 [0] : vector<128x256xf32> to vector<256xf32>
    %18 = vector.shape_cast %17 : vector<256xf32> to vector<1x256xf32>
    %19 = vector.broadcast %18 : vector<1x256xf32> to vector<8x256xf32>
    %20 = arith.addf %15, %19 : vector<8x256xf32>
    %c0_14 = arith.constant 0 : index
    %c0_15 = arith.constant 0 : index
    %21 = vector.load %arg6[%c0_14, %c0_15] : memref<8x256xf32, #tpu.memory_space<vmem>>, vector<8x256xf32>
    tpu.vector_store %arg6[%c0_14, %c0_15], %20 {strides = array<i32>} : memref<8x256xf32, #tpu.memory_space<vmem>>, vector<8x256xf32>,
    return
  }
  func.func @transform_0(%arg0: i32, %arg1: i32) -> (i32, i32) {
    %c1_i32 = arith.constant 1 : i32
    %0 = arith.muli %arg0, %c1_i32 : i32
    %1 = arith.addi %0, %arg1 : i32
    %c0_i32 = arith.constant 0 : i32
    %c0_i32_0 = arith.constant 0 : i32
    return %1, %c0_i32 : i32, i32
  }
  func.func @transform_1(%arg0: i32, %arg1: i32) -> (i32, i32) {
    %c0_i32 = arith.constant 0 : i32
    %c0_i32_0 = arith.constant 0 : i32
    %c0_i32_1 = arith.constant 0 : i32
    return %c0_i32, %c0_i32_0 : i32, i32
  }
  func.func @transform_2(%arg0: i32, %arg1: i32) -> (i32, i32) {
    %c0_i32 = arith.constant 0 : i32
    %c0_i32_0 = arith.constant 0 : i32
    %c0_i32_1 = arith.constant 0 : i32
    return %c0_i32, %c0_i32_0 : i32, i32
  }
  func.func @transform_3(%arg0: i32, %arg1: i32) -> (i32, i32) {
    %c0_i32 = arith.constant 0 : i32
    %c0_i32_0 = arith.constant 0 : i32
    return %arg0, %c0_i32 : i32, i32
  }
  func.func @transform_4(%arg0: i32, %arg1: i32) -> (i32, i32) {
    %c0_i32 = arith.constant 0 : i32
    %c0_i32_0 = arith.constant 0 : i32
    return %arg0, %c0_i32 : i32, i32
  }
}

</mosaic_0001>

<bundles_post_ra>
// kernel: tpu_custom_call.1
= control target key start
LH: loop header
LB: loop body
LE: loop exit
PB: predicated region body
PF: predicated region fallthrough
CT: control target
= control target key end

     0   :  { %10 = vsyncpa [#allocation3], 0  ;;  %s1783_s0 = inlined_call_operand.hbm [shape: bf16[256,256], index: 0, kind: input, shape index: {}]   ;;  %s1784_s1 = inlined_call_operand.hbm [shape: bf16[256,256], index: 1, kind: input, shape index: {}]   ;;  %s1785_s2 = inlined_call_operand.vmem [shape: f32[1,256], index: 2, kind: input, shape index: {}]   ;;  %s1786_s3 = inlined_call_operand.hbm [shape: f32[16,256], index: 3, kind: output, shape index: {0}]   ;;  %s1787_s4 = inlined_call_operand.hbm [shape: f32[16,256], index: 4, kind: output, shape index: {1}]  }
   0x1   :  { %12 = vsyncpa [#allocation3 + $0x1], 0 }
   0x2   :  { %13 = vsyncpa [#allocation6], 0 }
   0x3   :  { %14 = vsyncpa [#allocation4], 0 }
   0x4   :  { %16 = vsyncpa [#allocation4 + $0x1], 0 }
   0x5   :  { %17 = vsyncpa [#allocation9], 0 }
   0x6   :  { %19 = vsyncpa [#allocation9 + $0x1], 0  ;;  %s1432_s15 = smov 0   ;;  %s1434_s16 = smov 0  }
   0x7   :  { %s1436_s17 = smov 0   ;;  %s1438_s18 = smov 0  }
   0x8   :  { %s1440_s19 = smov 0   ;;  %s1442_s20 = smov 0  }
   0x9 LB: > { %s964_s21 = sadd.s32 4294967295, %s1399_s20   ;;  %s965_s22 = sadd.s32 4294967294, %s1399_s20   ;;  %s1399_s20 = sphi %s1442_s20, %s25_s20   ;;  %s1395_s19 = sphi %s1440_s19, %s1811_s19   ;;  %s1391_s18 = sphi %s1438_s18, %s1810_s18   ;;  %s1387_s17 = sphi %s1436_s17, %s1809_s17   ;;  %s1383_s16 = sphi %s1434_s16, %s1808_s16   ;;  %s1379_s15 = sphi %s1432_s15, %s1807_s15  }
   0xa   : > { %p59_p0 = scmp.ne.s32.totalorder %s1383_s16, %s1379_s15  ;;  %p1466_p1 = scmp.eq.s32.totalorder %s964_s21, 0 }
   0xb   : > { %p1470_p2 = scmp.eq.s32.totalorder %s964_s21, 1  ;;  %p131_p3 = scmp.eq.s32.totalorder %s965_s22, 1 }
   0xc   : > { %s1792_s23 = scalar_select %p1466_p1, 1, 0 }
   0xd   : > { %s1793_s24 = scalar_select %p1470_p2, 1, 0 }
   0xe   : > { %p1476_p4 = por %p1466_p1, %p59_p0  ;;  %p966_p5 = scmp.ge.s32.totalorder %s1399_s20, 1 }
   0xf   : > { %p1481_p6 = por %p131_p3, %p59_p0  ;;  %p164_p7 = scmp.lt.s32.totalorder %s1399_s20, 3 }
  0x10   : > { %s1794_s25 = scalar_select %p1476_p4, 1, 0 }
  0x11   : > { %s1795_s26 = scalar_select %p1481_p6, 1, 0 }
  0x12   : > { %p1486_p8 = pnand %p966_p5, %p164_p7  ;;  %s1401_s28 = smov [#allocation5]  }
  0x13   : > { %s176_s29 = sshll.u32 %s1401_s28, 4  ;;  %s37_s5 = sadd.s32 1, %s1395_s19  ;;  %s177_s29 = int_to_ptr.vmem [resolvable:$true] %s176_s29 }
  0x14   : > { %s1796_s27 = scalar_select %p1486_p8, 1, 0 }
  0x15   : > { %p1080_p9 = pneg %p1486_p8  ;;  %s1223_s8 = scalar_lea.hbm %s1784_s1, 4096 }
  0x16   : > { %p1224_p12 = scmp.ne.s32.totalorder %s1784_s1, %s1223_s8  ;;  %p1230_p5 = scmp.lt.u32.totalorder %s1223_s8, %s1784_s1 }
  0x17   : > { %p1495_p11 = pnand %p1080_p9, %p1466_p1 }
  0x19   : > { %p1225_p13 = pneg %p1495_p11 }
  0x1b   : > { %p1226_p0 = pnand %p1225_p13, %p1224_p12 }
  0x1d   : > { %p1227_p3 = pneg %p1226_p0 }
  0x1f   : > { %p1232_p7 = pnand %p1230_p5, %p1227_p3 }
  0x21   : > { %1235 = shalt.err (!%p1232_p7)
}
  0x22   : > { %s1236_s13 = scalar_lea.vmem %s177_s29, 4096  ;;  %p1244_p1 = scmp.lt.s32.totalorder %s177_s29, %s177_s29 }
  0x23   : > { %p1237_p9 = scmp.ne.s32.totalorder %s177_s29, %s1236_s13  ;;  %p1245_p4 = scmp.lt.s32.totalorder %s1236_s13, %s1236_s13 }
  0x25   : > { %p1239_p10 = pnand %p1237_p9, %p1225_p13  ;;  %p1246_p8 = por %p1245_p4, %p1244_p1 }
  0x27   : > { %p1240_p6 = pneg %p1239_p10 }
  0x29   : > { %p1247_p2 = pnand %p1246_p8, %p1240_p6 }
  0x2b   : > { %1250 = shalt.err (!%p1247_p2)
}
  0x2c   : > { %s1402_s14 = smov 128   ;;  %s1403_s21 = smov 8  }
  0x2d   : > { %1083 = dma.hbm_to_vmem [thread:$0]  (!%p1495_p11), %s1784_s1, 4096, %s177_s29, [#allocation6], %s1402_s14, %s1402_s14, %s1403_s21  }
  0x2e   : > { %p39_p1 = scmp.ge.s32.totalorder %s37_s5, 2  ;;  %s46_s6 = sadd.s32 1, %s1387_s17 }
  0x2f   : > { %p53_p2 = scmp.ne.s32.totalorder %s1387_s17, %s1383_s16  ;;  %p54_p4 = scmp.eq.s32.totalorder %s1399_s20, 0 }
  0x30   : > { %s1813_s5 = smov (%p39_p1, %s37_s5), 0  ;;  %p1799_p8 = scmp.ne.s32.totalorder %s1793_s24, 0 }
  0x31   : > { %p1525_p6 = por %p54_p4, %p53_p2  ;;  %s43_s8 = ssub.s32 %s1395_s19, %s1813_s5 }
  0x32   : > { %p1531_p10 = por %p1799_p8, %p53_p2  ;;  %p1096_p12 = scmp.lt.s32.totalorder %s1399_s20, 2 }
  0x33   : > { %p44_p11 = scmp.eq.s32.totalorder %s43_s8, 0  ;;  %s193_s29 = sand.u32 1, %s1387_s17  }
  0x34   : > { %s969_s9 = sshll.u32 %s193_s29, 7  ;;  %s1035_s11 = sshll.u32 %s1395_s19, 11 }
  0x35   : > { %s1540_s10 = scalar_select %p44_p11, %s1387_s17, %s46_s6  }
  0x36   : > { %s1546_s22 = scalar_lea.hbm %s1783_s0, %s1035_s11  ;;  %s197_s24 = scalar_lea.vmem [#allocation2], %s969_s9 }
  0x37   : > { %s206_s28 = sshll.u32 %s197_s24, 4  ;;  %p1552_p13 = pnand %p1096_p12, %p1525_p6  ;;  %s1548_s28 = int_to_ptr.vmem [resolvable:$true] %s206_s28 }
  0x38   : > { %s1556_s6 = scalar_lea.sflag [#allocation3], %s193_s29  ;;  %s1251_s12 = scalar_lea.hbm %s1546_s22, 2048 }
  0x39   : > { %p1252_p0 = scmp.ne.s32.totalorder %s1546_s22, %s1251_s12  ;;  %p1253_p3 = pneg %p1552_p13 }
  0x3a   : > { %s1256_s7 = scalar_lea.hbm %s1783_s0, 4096  ;;  %p1257_p9 = scmp.lt.u32.totalorder %s1546_s22, %s1783_s0 }
  0x3b   : > { %p1254_p5 = pnand %p1253_p3, %p1252_p0  ;;  %p1258_p1 = scmp.lt.u32.totalorder %s1256_s7, %s1251_s12 }
  0x3c   : > { %p1260_p4 = scmp.lt.u32.totalorder %s1251_s12, %s1546_s22 }
  0x3d   : > { %p1255_p7 = pneg %p1254_p5  ;;  %p1259_p2 = por %p1258_p1, %p1257_p9 }
  0x3f   : > { %p1261_p6 = por %p1260_p4, %p1259_p2 }
  0x41   : > { %p1262_p8 = pnand %p1261_p6, %p1255_p7 }
  0x43   : > { %1265 = shalt.err (!%p1262_p8)
}
  0x44   : > { %s1266_s29 = scalar_lea.vmem %s1548_s28, 2048  ;;  %s1404_s9 = smov [#allocation2]  }
  0x45   : > { %p1267_p12 = scmp.ne.s32.totalorder %s1548_s28, %s1266_s29  ;;  %s1271_s11 = sshll.u32 %s1404_s9, 4  ;;  %s1272_s11 = int_to_ptr.vmem [resolvable:$false] %s1271_s11 }
  0x46   : > { %s1273_s13 = scalar_lea.vmem %s1272_s11, 4096  ;;  %p1274_p5 = scmp.lt.s32.totalorder %s1548_s28, %s1272_s11 }
  0x47   : > { %p1269_p11 = pnand %p1267_p12, %p1253_p3  ;;  %p1275_p9 = scmp.lt.s32.totalorder %s1273_s13, %s1266_s29 }
  0x49   : > { %p1270_p0 = pneg %p1269_p11  ;;  %p1276_p1 = por %p1275_p9, %p1274_p5 }
  0x4b   : > { %p1277_p2 = pnand %p1276_p1, %p1270_p0 }
  0x4d   : > { %1280 = shalt.err (!%p1277_p2)
}
  0x4e   : > { %1087 = dma.hbm_to_vmem [thread:$0]  (!%p1552_p13), %s1546_s22, 2048, %s1548_s28, %s1556_s6, %s1402_s14, %s1402_s14, %s1403_s21  }
  0x4f   : > { %p1802_p3 = scmp.ne.s32.totalorder %s1796_s27, 0 }
  0x50   : > { %s1590_s12 = sand.u32 (!%p1802_p3), 1, %s1383_s16   ;;  %p1803_p7 = scmp.ne.s32.totalorder (!%p1802_p3), %s1794_s25, 0 }
  0x51   : > { %218 = sbr.rel (%p1802_p3) target bundleno = 466 (0x1d2), region = 32  ;;  %s974_s7 = sshll.u32 (!%p1802_p3), %s1590_s12, 7 }
  0x52   : > { %s221_s24 = scalar_lea.sflag (!%p1802_p3), [#allocation3], %s1590_s12  ;;  %s1594_s29 = scalar_lea.vmem (!%p1802_p3), [#allocation2], %s974_s7 }
  0x58   : > { %1362 = dma.done.wait (%p1803_p7), %s221_s24, 2048  }
  0x59   : > { %1364 = vsyncadd (%p1803_p7), %s221_s24, 4294965248  ;;  %p1804_p13 = scmp.ne.s32.totalorder %s1792_s23, 0 }
  0x5b   : > { %1366 = dma.done.wait (%p1804_p13), [#allocation6], 4096  }
  0x5c   : > { %1368 = vsyncadd (%p1804_p13), [#allocation6], 4294963200  ;;  %v1151_v0 = vld [vmem:[#allocation5 + $0x4] ss:$8 sps:$4 sm:$0xff]   ;;  %v1153_v1 = vld [vmem:[#allocation5] ss:$8 sps:$4 sm:$0xff]   ;;  %v318_v48 = vlaneseq }
  0x5d   : > { %568 = vmatprep.subr.bf16.mxu0 %v1151_v0  ;;  %v1154_v2 = vld [vmem:[#allocation5 + $0x14] ss:$8 sps:$4 sm:$0xff]   ;;  %1038 = vmatprep.subr.bf16.mxu1 %v1151_v0  ;;  %v1156_v3 = vld [vmem:[#allocation5 + $0x10] ss:$8 sps:$4 sm:$0xff]   ;;  %v1157_v4 = vld [vmem:[#allocation5 + $0x24] ss:$8 sps:$4 sm:$0xff]  }
  0x5e   : > { %569 = vmatpush1.bf16.msra.mxu0 %v1153_v1  ;;  %1054 = vmatpush1.bf16.msra.mxu1 %v1153_v1  ;;  %v1159_v5 = vld [vmem:[#allocation5 + $0x20] ss:$8 sps:$4 sm:$0xff]   ;;  %v1160_v6 = vld [vmem:[#allocation5 + $0x34] ss:$8 sps:$4 sm:$0xff]   ;;  %v1162_v7 = vld [vmem:[#allocation5 + $0x30] ss:$8 sps:$4 sm:$0xff]  }
  0x5f   : > { %570 = vmatprep.subr.bf16.mxu0 %v1154_v2  ;;  %1039 = vmatprep.subr.bf16.mxu1 %v1154_v2  ;;  %v1163_v8 = vld [vmem:[#allocation5 + $0x44] ss:$8 sps:$4 sm:$0xff]   ;;  %v1165_v9 = vld [vmem:[#allocation5 + $0x40] ss:$8 sps:$4 sm:$0xff]   ;;  %v1166_v10 = vld [vmem:[#allocation5 + $0x54] ss:$8 sps:$4 sm:$0xff]  }
  0x60   : > { %v1168_v11 = vld [vmem:[#allocation5 + $0x50] ss:$8 sps:$4 sm:$0xff]   ;;  %v1169_v12 = vld [vmem:[#allocation5 + $0x64] ss:$8 sps:$4 sm:$0xff]   ;;  %v1171_v14 = vld [vmem:[#allocation5 + $0x60] ss:$8 sps:$4 sm:$0xff]  }
  0x61   : > { %v1201_v13 = vld [vmem:[%s1594_s29 + $0x4] ss:$8 sps:$4 sm:$0xff]   ;;  %v1172_v15 = vld [vmem:[#allocation5 + $0x74] ss:$8 sps:$4 sm:$0xff]   ;;  %v1174_v17 = vld [vmem:[#allocation5 + $0x70] ss:$8 sps:$4 sm:$0xff]  }
  0x62   : > { %571 = vmatpush1.bf16.msra.mxu0 %v1156_v3  ;;  %1055 = vmatpush1.bf16.msra.mxu1 %v1156_v3  ;;  %v1207_v16 = vld [vmem:[%s1594_s29 + $0x44] ss:$8 sps:$4 sm:$0xff]   ;;  %v1177_v19 = vld [vmem:[#allocation5 + $0x80] ss:$8 sps:$4 sm:$0xff]   ;;  %v1178_v20 = vld [vmem:[#allocation5 + $0x94] ss:$8 sps:$4 sm:$0xff]  }
  0x63   : > { %572 = vmatprep.subr.bf16.mxu0 %v1157_v4  ;;  %1040 = vmatprep.subr.bf16.mxu1 %v1157_v4  ;;  %v1175_v18 = vld [vmem:[#allocation5 + $0x84] ss:$8 sps:$4 sm:$0xff]   ;;  %v1180_v21 = vld [vmem:[#allocation5 + $0x90] ss:$8 sps:$4 sm:$0xff]   ;;  %v1183_v23 = vld [vmem:[#allocation5 + $0xa0] ss:$8 sps:$4 sm:$0xff]  }
  0x64   : > { %600 = vmatprep.mubr.bf16.mxu0 %v1201_v13  ;;  %640 = vmatprep.mubr.bf16.mxu1 %v1207_v16  ;;  %v1181_v22 = vld [vmem:[#allocation5 + $0xa4] ss:$8 sps:$4 sm:$0xff]   ;;  %v1184_v24 = vld [vmem:[#allocation5 + $0xb4] ss:$8 sps:$4 sm:$0xff]   ;;  %v1186_v25 = vld [vmem:[#allocation5 + $0xb0] ss:$8 sps:$4 sm:$0xff]  }
  0x65   : > { %v1187_v26 = vld [vmem:[#allocation5 + $0xc4] ss:$8 sps:$4 sm:$0xff]   ;;  %v1189_v27 = vld [vmem:[#allocation5 + $0xc0] ss:$8 sps:$4 sm:$0xff]   ;;  %v1190_v28 = vld [vmem:[#allocation5 + $0xd4] ss:$8 sps:$4 sm:$0xff]  }
  0x66   : > { %573 = vmatpush1.bf16.msra.mxu0 %v1159_v5  ;;  %1056 = vmatpush1.bf16.msra.mxu1 %v1159_v5  ;;  %v1192_v29 = vld [vmem:[#allocation5 + $0xd0] ss:$8 sps:$4 sm:$0xff]   ;;  %v1193_v30 = vld [vmem:[#allocation5 + $0xe4] ss:$8 sps:$4 sm:$0xff]   ;;  %v1195_v31 = vld [vmem:[#allocation5 + $0xe0] ss:$8 sps:$4 sm:$0xff]  }
  0x67   : > { %574 = vmatprep.subr.bf16.mxu0 %v1160_v6  ;;  %1041 = vmatprep.subr.bf16.mxu1 %v1160_v6  ;;  %v1196_v32 = vld [vmem:[#allocation5 + $0xf4] ss:$8 sps:$4 sm:$0xff]   ;;  %v1198_v33 = vld [vmem:[#allocation5 + $0xf0] ss:$8 sps:$4 sm:$0xff]   ;;  %v1199_v34 = vld [vmem:[%s1594_s29] ss:$8 sps:$4 sm:$0xff]  }
  0x68   : > { %v1205_v35 = vld [vmem:[%s1594_s29 + $0x40] ss:$8 sps:$4 sm:$0xff]   ;;  %v1202_v36 = vld [vmem:[%s1594_s29 + $0x14] ss:$8 sps:$4 sm:$0xff]   ;;  %v1204_v38 = vld [vmem:[%s1594_s29 + $0x10] ss:$8 sps:$4 sm:$0xff]  }
  0x69   : > { %v1211_v37 = vld [vmem:[%s1594_s29 + $0x54] ss:$8 sps:$4 sm:$0xff]   ;;  %v1213_v39 = vld [vmem:[%s1594_s29 + $0x50] ss:$8 sps:$4 sm:$0xff]   ;;  %v1208_v40 = vld [vmem:[%s1594_s29 + $0x24] ss:$8 sps:$4 sm:$0xff]  }
  0x6a   : > { %575 = vmatpush1.bf16.msra.mxu0 %v1162_v7  ;;  %1057 = vmatpush1.bf16.msra.mxu1 %v1162_v7  ;;  %v1217_v41 = vld [vmem:[%s1594_s29 + $0x64] ss:$8 sps:$4 sm:$0xff]   ;;  %v1210_v42 = vld [vmem:[%s1594_s29 + $0x20] ss:$8 sps:$4 sm:$0xff]   ;;  %v1214_v44 = vld [vmem:[%s1594_s29 + $0x34] ss:$8 sps:$4 sm:$0xff]  }
  0x6b   : > { %576 = vmatprep.subr.bf16.mxu0 %v1163_v8  ;;  %1042 = vmatprep.subr.bf16.mxu1 %v1163_v8  ;;  %v1219_v43 = vld [vmem:[%s1594_s29 + $0x60] ss:$8 sps:$4 sm:$0xff]   ;;  %v1220_v45 = vld [vmem:[%s1594_s29 + $0x74] ss:$8 sps:$4 sm:$0xff]   ;;  %v1216_v46 = vld [vmem:[%s1594_s29 + $0x30] ss:$8 sps:$4 sm:$0xff]  }
  0x6c   : > { %v1222_v47 = vld [vmem:[%s1594_s29 + $0x70] ss:$8 sps:$4 sm:$0xff]   ;;  %v319_v49 = vshrl.u32 %v318_v48, 7  ;;  %v316_v51 = vld [vmem:[%s1785_s2] sm:$0x3]  ;;  %s976_s27 = sshll.u32 %s1590_s12, 4 }
  0x6d   : > { %s1036_s14 = sshll.u32 %s1391_s18, 8  ;;  %s250_s21 = scalar_lea.vmem [#allocation7], %s976_s27 }
  0x6e   : > { %577 = vmatpush1.bf16.msra.mxu0 %v1165_v9  ;;  %1058 = vmatpush1.bf16.msra.mxu1 %v1165_v9  ;;  %v320_v50 = vsub.s32 0, %v319_v49  ;;  %v324_v52 = vsub.s32 1, %v319_v49  ;;  %s829_s22 = sshll.u32 %s250_s21, 4  ;;  %s1697_s28 = scalar_lea.vmem [#allocation8], %s976_s27  ;;  %s1705_s22 = int_to_ptr.vmem [resolvable:$true] %s829_s22 }
  0x6f   : > { %578 = vmatprep.subr.bf16.mxu0 %v1166_v10  ;;  %1043 = vmatprep.subr.bf16.mxu1 %v1166_v10  ;;  %s843_s8 = sshll.u32 %s1697_s28, 4  ;;  %s1703_s11 = scalar_lea.hbm %s1786_s3, %s1036_s14  ;;  %s1712_s8 = int_to_ptr.vmem [resolvable:$true] %s843_s8 }
  0x70   : > { %v1623_v53 = vrot.slane %v316_v51, %v320_v50  ;;  %v1625_v54 = vrot.slane %v316_v51, %v324_v52  ;;  %s1710_s7 = scalar_lea.hbm %s1787_s4, %s1036_s14  ;;  %s810_s24 = scalar_lea.sflag [#allocation4], %s1590_s12 }
  0x71   : > { %s1281_s29 = scalar_lea.vmem %s1705_s22, 256  ;;  %s1405_s23 = smov [#allocation7]  }
  0x72   : > { %579 = vmatpush1.bf16.msra.mxu0 %v1168_v11  ;;  %1059 = vmatpush1.bf16.msra.mxu1 %v1168_v11  ;;  %p1282_p4 = scmp.ne.s32.totalorder %s1705_s22, %s1281_s29  ;;  %s1285_s25 = sshll.u32 %s1405_s23, 4  ;;  %s1286_s25 = int_to_ptr.vmem [resolvable:$false] %s1285_s25 }
  0x73   : > { %580 = vmatprep.subr.bf16.mxu0 %v1169_v12  ;;  %1044 = vmatprep.subr.bf16.mxu1 %v1169_v12  ;;  %s1287_s27 = scalar_lea.vmem %s1286_s25, 512  ;;  %p1288_p12 = scmp.lt.s32.totalorder %s1705_s22, %s1286_s25 }
  0x74   : > { %p1283_p6 = pnand %p1282_p4, %p1531_p10  ;;  %p1289_p11 = scmp.lt.s32.totalorder %s1287_s27, %s1281_s29 }
  0x76   : > { %581 = vmatpush1.bf16.msra.mxu0 %v1171_v14  ;;  %1060 = vmatpush1.bf16.msra.mxu1 %v1171_v14  ;;  %p1284_p8 = pneg %p1283_p6  ;;  %p1290_p0 = por %p1289_p11, %p1288_p12 }
  0x77   : > { %582 = vmatprep.subr.bf16.mxu0 %v1172_v15  ;;  %1045 = vmatprep.subr.bf16.mxu1 %v1172_v15 }
  0x78   : > { %p1291_p5 = pnand %p1290_p0, %p1284_p8 }
  0x7a   : > { %583 = vmatpush1.bf16.msra.mxu0 %v1174_v17  ;;  %1061 = vmatpush1.bf16.msra.mxu1 %v1174_v17 }
  0x7b   : > { %584 = vmatprep.subr.bf16.mxu0 %v1175_v18  ;;  %1046 = vmatprep.subr.bf16.mxu1 %v1175_v18 }
  0x7e   : > { %585 = vmatpush1.bf16.msra.mxu0 %v1177_v19  ;;  %1062 = vmatpush1.bf16.msra.mxu1 %v1177_v19 }
  0x7f   : > { %586 = vmatprep.subr.bf16.mxu0 %v1178_v20  ;;  %1047 = vmatprep.subr.bf16.mxu1 %v1178_v20 }
  0x82   : > { %587 = vmatpush1.bf16.msra.mxu0 %v1180_v21  ;;  %1063 = vmatpush1.bf16.msra.mxu1 %v1180_v21 }
  0x83   : > { %588 = vmatprep.subr.bf16.mxu0 %v1181_v22  ;;  %1048 = vmatprep.subr.bf16.mxu1 %v1181_v22 }
  0x86   : > { %589 = vmatpush1.bf16.msra.mxu0 %v1183_v23  ;;  %1064 = vmatpush1.bf16.msra.mxu1 %v1183_v23 }
  0x87   : > { %590 = vmatprep.subr.bf16.mxu0 %v1184_v24  ;;  %1049 = vmatprep.subr.bf16.mxu1 %v1184_v24 }
  0x8a   : > { %591 = vmatpush1.bf16.msra.mxu0 %v1186_v25  ;;  %1065 = vmatpush1.bf16.msra.mxu1 %v1186_v25 }
  0x8b   : > { %592 = vmatprep.subr.bf16.mxu0 %v1187_v26  ;;  %1050 = vmatprep.subr.bf16.mxu1 %v1187_v26 }
  0x8e   : > { %593 = vmatpush1.bf16.msra.mxu0 %v1189_v27  ;;  %1066 = vmatpush1.bf16.msra.mxu1 %v1189_v27 }
  0x8f   : > { %594 = vmatprep.subr.bf16.mxu0 %v1190_v28  ;;  %1051 = vmatprep.subr.bf16.mxu1 %v1190_v28 }
  0x92   : > { %595 = vmatpush1.bf16.msra.mxu0 %v1192_v29  ;;  %1067 = vmatpush1.bf16.msra.mxu1 %v1192_v29 }
  0x93   : > { %596 = vmatprep.subr.bf16.mxu0 %v1193_v30  ;;  %1052 = vmatprep.subr.bf16.mxu1 %v1193_v30 }
  0x96   : > { %597 = vmatpush1.bf16.msra.mxu0 %v1195_v31  ;;  %1068 = vmatpush1.bf16.msra.mxu1 %v1195_v31 }
  0x97   : > { %598 = vmatprep.subr.bf16.mxu0 %v1196_v32  ;;  %1053 = vmatprep.subr.bf16.mxu1 %v1196_v32 }
  0x9a   : > { %599 = vmatpush1.bf16.msra.mxu0 %v1198_v33  ;;  %1069 = vmatpush1.bf16.msra.mxu1 %v1198_v33 }
  0x9d   : > { %601 = vmatmul.mubr.bf16.vlgmr.msra.gmra.mrb[0].mxu0 %v1199_v34  ;;  %641 = vmatmul.mubr.bf16.vlgmr.msra.gmra.mrb[0].mxu1 %v1205_v35 }
  0x9e   : > { %610 = vmatprep.mubr.bf16.mxu0 %v1202_v36  ;;  %650 = vmatprep.mubr.bf16.mxu1 %v1211_v37 }
  0xa5   : > { %611 = vmatmul.mubr.bf16.gmra.mrb[4].mxu0 %v1204_v38  ;;  %651 = vmatmul.mubr.bf16.gmra.mrb[4].mxu1 %v1213_v39 }
  0xa6   : > { %620 = vmatprep.mubr.bf16.mxu0 %v1208_v40  ;;  %660 = vmatprep.mubr.bf16.mxu1 %v1217_v41 }
  0xad   : > { %621 = vmatmul.mubr.bf16.gmra.mrb[8].mxu0 %v1210_v42  ;;  %661 = vmatmul.mubr.bf16.gmra.mrb[8].mxu1 %v1219_v43 }
  0xae   : > { %630 = vmatprep.mubr.bf16.mxu0 %v1214_v44  ;;  %670 = vmatprep.mubr.bf16.mxu1 %v1220_v45 }
  0xb5   : > { %631 = vmatmul.mubr.bf16.gmra.mrb[12].mxu0 %v1216_v46  ;;  %671 = vmatmul.mubr.bf16.gmra.mrb[12].mxu1 %v1222_v47 }
 0x170   : > { %v602_v55 = vpop.f32.mrb[0].mxu0  ;;  %v1627_v56 = vpop.f32.mrb[0].mxu1 }
 0x171   : > { %v603_v57 = vadd.f32 %v602_v55, %v1623_v53  ;;  %v604_v58 = vpop.f32.mrb[1].mxu0  ;;  %v1630_v59 = vpop.f32.mrb[1].mxu1 }
 0x172   : > { %v605_v60 = vadd.f32 %v604_v58, %v1625_v54  ;;  %v606_v61 = vpop.f32.mrb[2].mxu0  ;;  %v1633_v62 = vpop.f32.mrb[2].mxu1 }
 0x173   : > { %v607_v63 = vadd.f32 %v606_v61, %v1623_v53  ;;  %v608_v0 = vpop.f32.mrb[3].mxu0  ;;  %v1636_v1 = vpop.f32.mrb[3].mxu1  ;;  %v731_v3 = vmul.f32 %v603_v57, %v603_v57 }
 0x174   : > { %v609_v2 = vadd.f32 %v608_v0, %v1625_v54  ;;  %v732_v6 = vmul.f32 %v605_v60, %v605_v60 }
 0x175   : > { %v683_v4 = vadd.f32 %v607_v63, %v603_v57  ;;  %v733_v5 = vmul.f32 %v607_v63, %v607_v63 }
 0x176   : > { %v704_v7 = vadd.f32 %v609_v2, %v605_v60  ;;  %v734_v8 = vmul.f32 %v609_v2, %v609_v2 }
 0x177   : > { %v763_v9 = vadd.f32 %v733_v5, %v731_v3 }
 0x178   : > { %v784_v10 = vadd.f32 %v734_v8, %v732_v6  ;;  %v612_v11 = vpop.f32.mrb[4].mxu0  ;;  %v1639_v12 = vpop.f32.mrb[4].mxu1  ;;  %v643_v6 = vadd.f32 %v1627_v56, %v1623_v53 }
 0x179   : > { %v613_v13 = vadd.f32 %v612_v11, %v1623_v53  ;;  %v614_v14 = vpop.f32.mrb[5].mxu0  ;;  %v1642_v15 = vpop.f32.mrb[5].mxu1  ;;  %v647_v11 = vadd.f32 %v1633_v62, %v1623_v53 }
 0x17a   : > { %v615_v16 = vadd.f32 %v614_v14, %v1625_v54  ;;  %v616_v17 = vpop.f32.mrb[6].mxu0  ;;  %v1645_v18 = vpop.f32.mrb[6].mxu1  ;;  %v655_v62 = vadd.f32 %v1642_v15, %v1625_v54 }
 0x17b   : > { %v684_v19 = vadd.f32 %v683_v4, %v613_v13  ;;  %v735_v20 = vmul.f32 %v613_v13, %v613_v13  ;;  %v617_v21 = vadd.f32 %v616_v17, %v1623_v53  ;;  %v618_v22 = vpop.f32.mrb[7].mxu0  ;;  %v1648_v23 = vpop.f32.mrb[7].mxu1 }
 0x17c   : > { %v705_v24 = vadd.f32 %v704_v7, %v615_v16  ;;  %v736_v25 = vmul.f32 %v615_v16, %v615_v16  ;;  %v619_v26 = vadd.f32 %v618_v22, %v1625_v54  ;;  %v645_v7 = vadd.f32 %v1630_v59, %v1625_v54 }
 0x17d   : > { %v764_v27 = vadd.f32 %v763_v9, %v735_v20  ;;  %v685_v28 = vadd.f32 %v684_v19, %v617_v21  ;;  %v737_v29 = vmul.f32 %v617_v21, %v617_v21  ;;  %v649_v20 = vadd.f32 %v1636_v1, %v1625_v54 }
 0x17e   : > { %v785_v30 = vadd.f32 %v784_v10, %v736_v25  ;;  %v706_v31 = vadd.f32 %v705_v24, %v619_v26  ;;  %v738_v32 = vmul.f32 %v619_v26, %v619_v26  ;;  %v653_v22 = vadd.f32 %v1639_v12, %v1623_v53 }
 0x17f   : > { %v765_v33 = vadd.f32 %v764_v27, %v737_v29  ;;  %v657_v12 = vadd.f32 %v1645_v18, %v1623_v53  ;;  %v659_v15 = vadd.f32 %v1648_v23, %v1625_v54 }
 0x180   : > { %v786_v34 = vadd.f32 %v785_v30, %v738_v32  ;;  %v622_v35 = vpop.f32.mrb[8].mxu0  ;;  %v1651_v36 = vpop.f32.mrb[8].mxu1  ;;  %v747_v30 = vmul.f32 %v643_v6, %v643_v6 }
 0x181   : > { %v623_v37 = vadd.f32 %v622_v35, %v1623_v53  ;;  %v624_v38 = vpop.f32.mrb[9].mxu0  ;;  %v1654_v39 = vpop.f32.mrb[9].mxu1 }
 0x182   : > { %v625_v40 = vadd.f32 %v624_v38, %v1625_v54  ;;  %v626_v41 = vpop.f32.mrb[10].mxu0  ;;  %v1657_v42 = vpop.f32.mrb[10].mxu1  ;;  %v751_v38 = vmul.f32 %v653_v22, %v653_v22 }
 0x183   : > { %v686_v43 = vadd.f32 %v685_v28, %v623_v37  ;;  %v739_v44 = vmul.f32 %v623_v37, %v623_v37  ;;  %v627_v45 = vadd.f32 %v626_v41, %v1623_v53  ;;  %v628_v46 = vpop.f32.mrb[11].mxu0  ;;  %v1660_v47 = vpop.f32.mrb[11].mxu1  ;;  %v667_v18 = vadd.f32 %v1657_v42, %v1623_v53 }
 0x184   : > { %v707_v48 = vadd.f32 %v706_v31, %v625_v40  ;;  %v740_v49 = vmul.f32 %v625_v40, %v625_v40  ;;  %v629_v50 = vadd.f32 %v628_v46, %v1625_v54  ;;  %v748_v31 = vmul.f32 %v645_v7, %v645_v7 }
 0x185   : > { %v766_v51 = vadd.f32 %v765_v33, %v739_v44  ;;  %v687_v52 = vadd.f32 %v686_v43, %v627_v45  ;;  %v741_v55 = vmul.f32 %v627_v45, %v627_v45  ;;  %v749_v33 = vmul.f32 %v647_v11, %v647_v11 }
 0x186   : > { %v787_v57 = vadd.f32 %v786_v34, %v740_v49  ;;  %v708_v58 = vadd.f32 %v707_v48, %v629_v50  ;;  %v742_v60 = vmul.f32 %v629_v50, %v629_v50  ;;  %v750_v34 = vmul.f32 %v649_v20, %v649_v20 }
 0x187   : > { %v767_v61 = vadd.f32 %v766_v51, %v741_v55  ;;  %v752_v43 = vmul.f32 %v655_v62, %v655_v62  ;;  %v663_v48 = vadd.f32 %v1651_v36, %v1623_v53  ;;  %v665_v50 = vadd.f32 %v1654_v39, %v1625_v54 }
 0x188   : > { %v788_v63 = vadd.f32 %v787_v57, %v742_v60  ;;  %v632_v0 = vpop.f32.mrb[12].mxu0  ;;  %v672_v2 = vpop.f32.mrb[12].mxu1  ;;  %v669_v55 = vadd.f32 %v1660_v47, %v1625_v54  ;;  %v753_v57 = vmul.f32 %v657_v12, %v657_v12  ;;  %v757_v42 = vmul.f32 %v667_v18, %v667_v18 }
 0x189   : > { %v633_v3 = vadd.f32 %v632_v0, %v1623_v53  ;;  %v634_v4 = vpop.f32.mrb[13].mxu0  ;;  %v674_v5 = vpop.f32.mrb[13].mxu1  ;;  %v673_v60 = vadd.f32 %v672_v2, %v1623_v53  ;;  %v755_v39 = vmul.f32 %v663_v48, %v663_v48 }
 0x18a   : > { %v635_v8 = vadd.f32 %v634_v4, %v1625_v54  ;;  %v636_v9 = vpop.f32.mrb[14].mxu0  ;;  %v676_v10 = vpop.f32.mrb[14].mxu1  ;;  %v675_v0 = vadd.f32 %v674_v5, %v1625_v54 }
 0x18b   : > { %v688_v13 = vadd.f32 %v687_v52, %v633_v3  ;;  %v743_v14 = vmul.f32 %v633_v3, %v633_v3  ;;  %v637_v16 = vadd.f32 %v636_v9, %v1623_v53  ;;  %v638_v17 = vpop.f32.mrb[15].mxu0  ;;  %v678_v19 = vpop.f32.mrb[15].mxu1  ;;  %v758_v9 = vmul.f32 %v669_v55, %v669_v55 }
 0x18c   : > { %v709_v56 = vadd.f32 %v708_v58, %v635_v8  ;;  %v744_v21 = vmul.f32 %v635_v8, %v635_v8  ;;  %v639_v59 = vadd.f32 %v638_v17, %v1625_v54  ;;  %v760_v17 = vmul.f32 %v675_v0, %v675_v0 }
 0x18d   : > { %v768_v24 = vadd.f32 %v767_v61, %v743_v14  ;;  %v689_v25 = vadd.f32 %v688_v13, %v637_v16  ;;  %v745_v26 = vmul.f32 %v637_v16, %v637_v16  ;;  %v754_v61 = vmul.f32 %v659_v15, %v659_v15 }
 0x18e   : > { %v789_v27 = vadd.f32 %v788_v63, %v744_v21  ;;  %v710_v28 = vadd.f32 %v709_v56, %v639_v59  ;;  %v746_v29 = vmul.f32 %v639_v59, %v639_v59  ;;  %v759_v13 = vmul.f32 %v673_v60, %v673_v60 }
 0x18f   : > { %v690_v32 = vadd.f32 %v689_v25, %v643_v6  ;;  %v769_v1 = vadd.f32 %v768_v24, %v745_v26  ;;  %v756_v6 = vmul.f32 %v665_v50, %v665_v50  ;;  %v677_v14 = vadd.f32 %v676_v10, %v1623_v53 }
 0x190   : > { %v711_v35 = vadd.f32 %v710_v28, %v645_v7  ;;  %v790_v37 = vadd.f32 %v789_v27, %v746_v29 }
 0x191   : > { %v691_v40 = vadd.f32 %v690_v32, %v647_v11  ;;  %v770_v41 = vadd.f32 %v769_v1, %v747_v30  ;;  %v761_v25 = vmul.f32 %v677_v14, %v677_v14 }
 0x192   : > { %v712_v44 = vadd.f32 %v711_v35, %v649_v20  ;;  %v791_v45 = vadd.f32 %v790_v37, %v748_v31  ;;  %v679_v20 = vadd.f32 %v678_v19, %v1625_v54 }
 0x193   : > { %v771_v46 = vadd.f32 %v770_v41, %v749_v33  ;;  %v692_v49 = vadd.f32 %v691_v40, %v653_v22 }
 0x194   : > { %v792_v51 = vadd.f32 %v791_v45, %v750_v34  ;;  %v713_v52 = vadd.f32 %v712_v44, %v655_v62  ;;  %v762_v27 = vmul.f32 %v679_v20, %v679_v20 }
 0x195   : > { %v693_v23 = vadd.f32 %v692_v49, %v657_v12  ;;  %v772_v58 = vadd.f32 %v771_v46, %v751_v38 }
 0x196   : > { %v714_v63 = vadd.f32 %v713_v52, %v659_v15  ;;  %v793_v36 = vadd.f32 %v792_v51, %v752_v43 }
 0x197   : > { %v694_v3 = vadd.f32 %v693_v23, %v663_v48  ;;  %v773_v4 = vadd.f32 %v772_v58, %v753_v57 }
 0x198   : > { %v715_v7 = vadd.f32 %v714_v63, %v665_v50  ;;  %v794_v8 = vadd.f32 %v793_v36, %v754_v61 }
 0x199   : > { %v774_v11 = vadd.f32 %v773_v4, %v755_v39  ;;  %v695_v47 = vadd.f32 %v694_v3, %v667_v18 }
 0x19a   : > { %v795_v16 = vadd.f32 %v794_v8, %v756_v6  ;;  %v716_v2 = vadd.f32 %v715_v7, %v669_v55 }
 0x19b   : > { %v775_v56 = vadd.f32 %v774_v11, %v757_v42  ;;  %v696_v5 = vadd.f32 %v695_v47, %v673_v60 }
 0x19c   : > { %v796_v21 = vadd.f32 %v795_v16, %v758_v9  ;;  %v717_v59 = vadd.f32 %v716_v2, %v675_v0 }
 0x19d   : > { %v776_v22 = vadd.f32 %v775_v56, %v759_v13  ;;  %v697_v24 = vadd.f32 %v696_v5, %v677_v14 }
 0x19e   : > { %v797_v26 = vadd.f32 %v796_v21, %v760_v17  ;;  %v718_v62 = vadd.f32 %v717_v59, %v679_v20 }
 0x19f   : > { %v698_v28 = vrot.slane %v697_v24, 4  ;;  %v777_v29 = vadd.f32 %v776_v22, %v761_v25 }
 0x1a0   : > { %v719_v30 = vrot.slane %v718_v62, 4  ;;  %v798_v53 = vadd.f32 %v797_v26, %v762_v27 }
 0x1a1   : > { %v699_v10 = vadd.f32 %v698_v28, %v697_v24  ;;  %v778_v31 = vrot.slane %v777_v29, 4 }
 0x1a2   : > { %v720_v32 = vadd.f32 %v719_v30, %v718_v62  ;;  %v799_v1 = vrot.slane %v798_v53, 4 }
 0x1a3   : > { %v700_v54 = vrot.slane %v699_v10, 2  ;;  %v779_v19 = vadd.f32 %v778_v31, %v777_v29 }
 0x1a4   : > { %v721_v33 = vrot.slane %v720_v32, 2  ;;  %v800_v34 = vadd.f32 %v799_v1, %v798_v53 }
 0x1a5   : > { %v701_v35 = vadd.f32 %v700_v54, %v699_v10  ;;  %v780_v37 = vrot.slane %v779_v19, 2 }
 0x1a6   : > { %v722_v38 = vadd.f32 %v721_v33, %v720_v32  ;;  %v801_v12 = vrot.slane %v800_v34, 2 }
 0x1a7   : > { %v702_v40 = vrot.slane %v701_v35, 1  ;;  %v781_v41 = vadd.f32 %v780_v37, %v779_v19 }
 0x1a8   : > { %v723_v43 = vrot.slane %v722_v38, 1  ;;  %v802_v15 = vadd.f32 %v801_v12, %v800_v34 }
 0x1a9   : > { %v703_v44 = vadd.f32 %v702_v40, %v701_v35  ;;  %v782_v45 = vrot.slane %v781_v41, 1 }
 0x1aa   : > { %v724_v46 = vadd.f32 %v723_v43, %v722_v38  ;;  %v803_v48 = vrot.slane %v802_v15, 1 }
 0x1ab   : > { %v783_v49 = vadd.f32 %v782_v45, %v781_v41  ;;  %727 = vst [vmem:[%s250_s21] sm:$0xff] %v703_v44 }
 0x1ac   : > { %v804_v50 = vadd.f32 %v803_v48, %v802_v15  ;;  %728 = vst [vmem:[%s250_s21 + $0x8] sm:$0xff] %v724_v46 }
 0x1ad   : > { %807 = vst [vmem:[%s1697_s28] sm:$0xff] %v783_v49 }
 0x1ae   : > { %1294 = shalt.err (!%p1291_p5)
}
 0x1af   : > { %s1295_s14 = scalar_lea.hbm %s1703_s11, 256  ;;  %s1299_s9 = scalar_lea.hbm %s1786_s3, 512 }
 0x1b0   : > { %p1296_p9 = scmp.ne.s32.totalorder %s1703_s11, %s1295_s14  ;;  %p1300_p3 = scmp.lt.u32.totalorder %s1703_s11, %s1786_s3 }
 0x1b1   : > { %p1301_p7 = scmp.lt.u32.totalorder %s1299_s9, %s1295_s14  ;;  %p1303_p4 = scmp.lt.u32.totalorder %s1295_s14, %s1703_s11 }
 0x1b2   : > { %p1297_p1 = pnand %p1296_p9, %p1531_p10 }
 0x1b3   : > { %p1302_p13 = por %p1301_p7, %p1300_p3 }
 0x1b4   : > { %p1298_p2 = pneg %p1297_p1 }
 0x1b5   : > { %p1304_p6 = por %p1303_p4, %p1302_p13 }
 0x1b7   : > { %p1305_p8 = pnand %p1304_p6, %p1298_p2 }
 0x1b9   : > { %1308 = shalt.err (!%p1305_p8)
}
 0x1ba   : > { %1076 = dma.vmem_to_hbm [thread:$0]  (%p1531_p10), %s1705_s22, 256, %s1703_s11, %s810_s24   ;;  %808 = vst [vmem:[%s1697_s28 + $0x8] sm:$0xff] %v804_v50 }
 0x1bb   : > { %s815_s29 = scalar_lea.sflag [#allocation9], %s1590_s12  ;;  %s1309_s23 = scalar_lea.vmem %s1712_s8, 256 }
 0x1bc   : > { %p1310_p12 = scmp.ne.s32.totalorder %s1712_s8, %s1309_s23  ;;  %s1406_s25 = smov [#allocation8]  }
 0x1bd   : > { %s1313_s27 = sshll.u32 %s1406_s25, 4  ;;  %s1314_s27 = int_to_ptr.vmem [resolvable:$false] %s1313_s27 }
 0x1be   : > { %p1311_p11 = pnand %p1310_p12, %p1531_p10  ;;  %s1315_s14 = scalar_lea.vmem %s1314_s27, 512 }
 0x1bf   : > { %p1316_p5 = scmp.lt.s32.totalorder %s1712_s8, %s1314_s27  ;;  %p1317_p9 = scmp.lt.s32.totalorder %s1315_s14, %s1309_s23 }
 0x1c0   : > { %p1312_p0 = pneg %p1311_p11 }
 0x1c1   : > { %p1318_p1 = por %p1317_p9, %p1316_p5 }
 0x1c3   : > { %p1319_p2 = pnand %p1318_p1, %p1312_p0 }
 0x1c5   : > { %1322 = shalt.err (!%p1319_p2)
}
 0x1c6   : > { %s1323_s12 = scalar_lea.hbm %s1710_s7, 256  ;;  %s1327_s11 = scalar_lea.hbm %s1787_s4, 512 }
 0x1c7   : > { %p1324_p3 = scmp.ne.s32.totalorder %s1710_s7, %s1323_s12  ;;  %p1328_p4 = scmp.lt.u32.totalorder %s1710_s7, %s1787_s4 }
 0x1c8   : > { %p1329_p6 = scmp.lt.u32.totalorder %s1327_s11, %s1323_s12  ;;  %p1331_p12 = scmp.lt.u32.totalorder %s1323_s12, %s1710_s7 }
 0x1c9   : > { %p1325_p7 = pnand %p1324_p3, %p1531_p10 }
 0x1ca   : > { %p1330_p8 = por %p1329_p6, %p1328_p4 }
 0x1cb   : > { %p1326_p13 = pneg %p1325_p7 }
 0x1cc   : > { %p1332_p11 = por %p1331_p12, %p1330_p8 }
 0x1ce   : > { %p1333_p0 = pnand %p1332_p11, %p1326_p13 }
 0x1d0   : > { %1336 = shalt.err (!%p1333_p0)
}
 0x1d1   : > { %1077 = dma.vmem_to_hbm [thread:$0]  (%p1531_p10), %s1712_s8, 256, %s1710_s7, %s815_s29  }
 0x1d2 PF: > { %s855_s6 = sand.u32 1, %s1379_s15   ;;  %p1805_p5 = scmp.ne.s32.totalorder %s1795_s26, 0 }
 0x1d3   : > { %p1806_p9 = scmp.ge.s32.totalorder %s1399_s20, 2  ;;  %s856_s9 = scalar_lea.sflag [#allocation4], %s855_s6 }
 0x1d5   : > { %p1089_p1 = pnand %p1806_p9, %p1805_p5 }
 0x1d7   : > { %1370 = dma.done.wait (!%p1089_p1), %s856_s9, 256  }
 0x1d8   : > { %1372 = vsyncadd (!%p1089_p1), %s856_s9, 4294967040  ;;  %s865_s18 = scalar_lea.sflag [#allocation9], %s855_s6 }
 0x1d9   : > { %1374 = dma.done.wait (!%p1089_p1), %s865_s18, 256  }
 0x1da   : > { %1376 = vsyncadd (!%p1089_p1), %s865_s18, 4294967040  ;;  %s25_s20 = sadd.s32 1, %s1399_s20   ;;  %s1807_s15 = smov %s1383_s16 }
 0x1db   : > { %p22_p2 = scmp.ge.s32.totalorder %s25_s20, 4   ;;  %s1808_s16 = smov %s1387_s17 }
 0x1dc   : > { %s1809_s17 = smov %s1540_s10  ;;  %s1810_s18 = smov %s1395_s19 }
 0x1dd   : > { %s1811_s19 = smov %s1813_s5  ;;  %24 = sbr.rel (!%p22_p2) target bundleno = 9 (0x9), region = 102 }
 0x1e4   :  { %870 = vsyncpa [#allocation3], 1 }
 0x1e5   :  { %872 = vsyncpa [#allocation3 + $0x1], 1 }
 0x1e6   :  { %873 = vsyncpa [#allocation6], 1 }
 0x1e7   :  { %874 = vsyncpa [#allocation4], 1 }
 0x1e8   :  { %876 = vsyncpa [#allocation4 + $0x1], 1 }
 0x1e9   :  { %877 = vsyncpa [#allocation9], 1 }
 0x1ea   :  { %879 = vsyncpa [#allocation9 + $0x1], 1 }

</bundles_post_ra>
